<compile_context>
chip_gen: v7x
topology: tpu7x:2x2x1
jax: 0.10.0
libtpu: 0.0.40
codegen_flags: <defaults>
</compile_context>

<pallas_src>
import functools
import math

import jax
import jax.numpy as jnp
from jax import lax
from jax.experimental import pallas as pl
from jax.experimental.pallas import tpu as pltpu


def _sin_pos_emb_kernel(x_ref, f_ref, p_ref, o_ref, *, scale, group, dim):
    """x_ref: (rows, group) timesteps; f_ref/p_ref: (1, W); o_ref: (rows, W)."""
    xs = x_ref[...] * scale                         # (rows, group) f32, tiny
    if group == 1:
        # (rows, 1) * (1, dim) lane-broadcast -> (rows, dim)
        args = xs * f_ref[...]
    else:
        # Expand the g timesteps of each row across lanes: lane j*dim..(j+1)*dim-1
        # carries timestep j of the row.  g static selects, all VPU, exact.
        rows, W = o_ref.shape
        col = lax.broadcasted_iota(jnp.int32, (rows, W), 1)
        x_exp = jnp.zeros((rows, W), jnp.float32)
        for j in range(group):
            mask = jnp.logical_and(col >= j * dim, col < (j + 1) * dim)
            x_exp = jnp.where(mask, xs[:, j:j + 1], x_exp)
        args = x_exp * f_ref[...]
    # cos == sin(arg + pi/2): one transcendental per output element, one
    # full-width store, no concat.
    o_ref[...] = jnp.sin(args + p_ref[...]).astype(o_ref.dtype)


def sinusoidal_pos_emb(x, *, num_steps, dim, rescale_steps=4000.0,
                       out_dtype=jnp.float32, vmem_block_bytes=4 * 1024 * 1024):
    """Pallas SinusoidalPosEmb: x (B,) -> (B, dim) in out_dtype."""
    assert x.ndim == 1, "SinusoidalPosEmb expects a 1-D tensor of timesteps"
    assert dim % 2 == 0, "dim must be even (sin/cos halves)"
    assert dim >= 4, "dim must be >= 4 (dim==2 divides by zero in the reference)"
    B = x.shape[0]
    half = dim // 2
    scale = float(rescale_steps) / float(num_steps)
    emb_scale = math.log(10000.0) / (half - 1)

    # --- hoisted constant tables (built once, fed with a constant index_map) ---
    freqs = jnp.exp(jnp.arange(half, dtype=jnp.float32) * -emb_scale)     # (half,)
    freq_full = jnp.concatenate([freqs, freqs])                           # (dim,)
    phase_full = jnp.concatenate(
        [jnp.zeros((half,), jnp.float32),
         jnp.full((half,), math.pi / 2.0, dtype=jnp.float32)])            # (dim,)

    # --- lane-dense grouping: pack g timesteps per output row when dim < 128 ---
    if dim < 128:
        g = math.lcm(dim, 128) // dim
        if B % g != 0:
            g = 1            # fall back to the (still correct) ungrouped layout
    else:
        g = 1
    W = g * dim
    rows = B // g

    x2 = x.reshape(rows, g).astype(jnp.float32)          # tiny (B,) -> (rows, g)
    f_tab = jnp.tile(freq_full, (g,)).reshape(1, W)
    p_tab = jnp.tile(phase_full, (g,)).reshape(1, W)

    # --- row tile: as big as the VMEM budget allows (multiple of 8) ---
    tm = max(8, (vmem_block_bytes // (W * 4)) // 8 * 8)
    if rows <= tm:
        tm = rows            # block == full array dims is always legal
    grid = (pl.cdiv(rows, tm),)

    out_itemsize = jnp.dtype(out_dtype).itemsize
    cost = pl.CostEstimate(
        flops=4 * B * dim,
        transcendentals=B * dim,
        bytes_accessed=B * 4 + B * dim * out_itemsize + 2 * W * 4,
    )

    kernel = functools.partial(_sin_pos_emb_kernel, scale=scale, group=g, dim=dim)
    out = pl.pallas_call(
        kernel,
        out_shape=jax.ShapeDtypeStruct((rows, W), out_dtype),
        grid_spec=pl.GridSpec(
            grid=grid,
            in_specs=[
                pl.BlockSpec((tm, g), lambda i: (i, 0)),      # timesteps
                pl.BlockSpec((1, W), lambda i: (0, 0)),       # freq table (const)
                pl.BlockSpec((1, W), lambda i: (0, 0)),       # phase table (const)
            ],
            out_specs=pl.BlockSpec((tm, W), lambda i: (i, 0)),
        ),
        compiler_params=pltpu.CompilerParams(
            dimension_semantics=("parallel",),
        ),
        cost_estimate=cost,
    )(x2, f_tab, p_tab)

    # Row-major contiguous view back to (B, dim): free metadata reshape.
    return out.reshape(B, dim)


def sinusoidal_pos_emb_ref(x, *, num_steps, dim, rescale_steps=4000.0):
    xf = x.astype(jnp.float32) / float(num_steps) * float(rescale_steps)
    half = dim // 2
    emb = math.log(10000.0) / (half - 1)
    freqs = jnp.exp(jnp.arange(half, dtype=jnp.float32) * -emb)
    args = xf[:, None] * freqs[None, :]
    return jnp.concatenate((jnp.sin(args), jnp.cos(args)), axis=-1)


if __name__ == "__main__":
    key = jax.random.PRNGKey(0)
    num_steps, dim, B = 1000, 32, 8
    t = jax.random.randint(key, (B,), 0, num_steps).astype(jnp.float32)

    # Main case: dim=32 -> lane-dense grouped path (g=4, 128-wide output blocks).
    y = sinusoidal_pos_emb(t, num_steps=num_steps, dim=dim)
    y = jax.block_until_ready(y)
    y_ref = sinusoidal_pos_emb_ref(t, num_steps=num_steps, dim=dim)
    assert y.shape == (B, dim) and y.dtype == jnp.float32
    assert jnp.allclose(y, y_ref, atol=2e-3, rtol=2e-3), float(
        jnp.max(jnp.abs(y - y_ref)))

    # Secondary case: width/batch that cannot be grouped -> ungrouped path.
    B2, dim2 = 6, 20
    t2 = jax.random.randint(jax.random.PRNGKey(1), (B2,), 0, num_steps).astype(
        jnp.float32)
    y2 = jax.block_until_ready(
        sinusoidal_pos_emb(t2, num_steps=num_steps, dim=dim2))
    y2_ref = sinusoidal_pos_emb_ref(t2, num_steps=num_steps, dim=dim2)
    assert y2.shape == (B2, dim2)
    assert jnp.allclose(y2, y2_ref, atol=2e-3, rtol=2e-3), float(
        jnp.max(jnp.abs(y2 - y2_ref)))

    print("KERNEL_OK")
</pallas_src>

<mosaic_0001>
module attributes {stable_mosaic.version = 11 : i64} {
  func.func @_sin_pos_emb_kernel(%arg0: i32, %arg1: memref<2x4xf32, #tpu.memory_space<vmem>>, %arg2: memref<1x128xf32, #tpu.memory_space<vmem>>, %arg3: memref<1x128xf32, #tpu.memory_space<vmem>>, %arg4: memref<2x128xf32, #tpu.memory_space<vmem>>) attributes {dimension_semantics = [#tpu.dimension_semantics<parallel>], iteration_bounds = array<i64: 1>, scalar_prefetch = 0 : i64, scratch_operands = 0 : i64, tpu.core_type = #tpu.core_type<tc>, window_params = [{transform_indices = @transform_0, window_bounds = array<i64: 2, 4>}, {pipeline_mode = #tpu.pipeline_mode<synchronous>, transform_indices = @transform_1, window_bounds = array<i64: 1, 128>}, {pipeline_mode = #tpu.pipeline_mode<synchronous>, transform_indices = @transform_2, window_bounds = array<i64: 1, 128>}, {transform_indices = @transform_3, window_bounds = array<i64: 2, 128>}]} {
    %c0 = arith.constant 0 : index
    %c0_0 = arith.constant 0 : index
    %0 = vector.load %arg1[%c0, %c0_0] : memref<2x4xf32, #tpu.memory_space<vmem>>, vector<2x4xf32>
    %cst = arith.constant 4.000000e+00 : f32
    %1 = vector.broadcast %cst : f32 to vector<2x4xf32>
    %2 = arith.mulf %0, %1 : vector<2x4xf32>
    %3 = tpu.iota {dimensions = array<i32: 1>} : vector<2x128xi32>
    %cst_1 = arith.constant 0.000000e+00 : f32
    %4 = vector.broadcast %cst_1 : f32 to vector<2x128xf32>
    %c0_i32 = arith.constant 0 : i32
    %5 = vector.broadcast %c0_i32 : i32 to vector<2x128xi32>
    %6 = arith.cmpi sge, %3, %5 : vector<2x128xi32>
    %c32_i32 = arith.constant 32 : i32
    %7 = vector.broadcast %c32_i32 : i32 to vector<2x128xi32>
    %8 = arith.cmpi slt, %3, %7 : vector<2x128xi32>
    %9 = arith.andi %6, %8 : vector<2x128xi1>
    %10 = vector.extract_strided_slice %2 {offsets = [0, 0], sizes = [2, 1], strides = [1, 1]} : vector<2x4xf32> to vector<2x1xf32>
    %11 = vector.shape_cast %10 : vector<2x1xf32> to vector<2x1xf32>
    %12 = vector.broadcast %11 : vector<2x1xf32> to vector<2x128xf32>
    %13 = arith.select %9, %12, %4 : vector<2x128xi1>, vector<2x128xf32>
    %c32_i32_2 = arith.constant 32 : i32
    %14 = vector.broadcast %c32_i32_2 : i32 to vector<2x128xi32>
    %15 = arith.cmpi sge, %3, %14 : vector<2x128xi32>
    %c64_i32 = arith.constant 64 : i32
    %16 = vector.broadcast %c64_i32 : i32 to vector<2x128xi32>
    %17 = arith.cmpi slt, %3, %16 : vector<2x128xi32>
    %18 = arith.andi %15, %17 : vector<2x128xi1>
    %19 = vector.extract_strided_slice %2 {offsets = [0, 1], sizes = [2, 1], strides = [1, 1]} : vector<2x4xf32> to vector<2x1xf32>
    %20 = vector.shape_cast %19 : vector<2x1xf32> to vector<2x1xf32>
    %21 = vector.broadcast %20 : vector<2x1xf32> to vector<2x128xf32>
    %22 = arith.select %18, %21, %13 : vector<2x128xi1>, vector<2x128xf32>
    %c64_i32_3 = arith.constant 64 : i32
    %23 = vector.broadcast %c64_i32_3 : i32 to vector<2x128xi32>
    %24 = arith.cmpi sge, %3, %23 : vector<2x128xi32>
    %c96_i32 = arith.constant 96 : i32
    %25 = vector.broadcast %c96_i32 : i32 to vector<2x128xi32>
    %26 = arith.cmpi slt, %3, %25 : vector<2x128xi32>
    %27 = arith.andi %24, %26 : vector<2x128xi1>
    %28 = vector.extract_strided_slice %2 {offsets = [0, 2], sizes = [2, 1], strides = [1, 1]} : vector<2x4xf32> to vector<2x1xf32>
    %29 = vector.shape_cast %28 : vector<2x1xf32> to vector<2x1xf32>
    %30 = vector.broadcast %29 : vector<2x1xf32> to vector<2x128xf32>
    %31 = arith.select %27, %30, %22 : vector<2x128xi1>, vector<2x128xf32>
    %c96_i32_4 = arith.constant 96 : i32
    %32 = vector.broadcast %c96_i32_4 : i32 to vector<2x128xi32>
    %33 = arith.cmpi sge, %3, %32 : vector<2x128xi32>
    %c128_i32 = arith.constant 128 : i32
    %34 = vector.broadcast %c128_i32 : i32 to vector<2x128xi32>
    %35 = arith.cmpi slt, %3, %34 : vector<2x128xi32>
    %36 = arith.andi %33, %35 : vector<2x128xi1>
    %37 = vector.extract_strided_slice %2 {offsets = [0, 3], sizes = [2, 1], strides = [1, 1]} : vector<2x4xf32> to vector<2x1xf32>
    %38 = vector.shape_cast %37 : vector<2x1xf32> to vector<2x1xf32>
    %39 = vector.broadcast %38 : vector<2x1xf32> to vector<2x128xf32>
    %40 = arith.select %36, %39, %31 : vector<2x128xi1>, vector<2x128xf32>
    %c0_5 = arith.constant 0 : index
    %c0_6 = arith.constant 0 : index
    %41 = vector.load %arg2[%c0_5, %c0_6] : memref<1x128xf32, #tpu.memory_space<vmem>>, vector<1x128xf32>
    %42 = vector.broadcast %41 : vector<1x128xf32> to vector<2x128xf32>
    %43 = arith.mulf %40, %42 : vector<2x128xf32>
    %c0_7 = arith.constant 0 : index
    %c0_8 = arith.constant 0 : index
    %44 = vector.load %arg3[%c0_7, %c0_8] : memref<1x128xf32, #tpu.memory_space<vmem>>, vector<1x128xf32>
    %45 = vector.broadcast %44 : vector<1x128xf32> to vector<2x128xf32>
    %46 = arith.addf %43, %45 : vector<2x128xf32>
    %47 = math.sin %46 : vector<2x128xf32>
    %c0_9 = arith.constant 0 : index
    %c0_10 = arith.constant 0 : index
    %48 = vector.load %arg4[%c0_9, %c0_10] : memref<2x128xf32, #tpu.memory_space<vmem>>, vector<2x128xf32>
    tpu.vector_store %arg4[%c0_9, %c0_10], %47 {strides = array<i32>} : memref<2x128xf32, #tpu.memory_space<vmem>>, vector<2x128xf32>,
    return
  }
  func.func @transform_0(%arg0: i32) -> (i32, i32) {
    %c0_i32 = arith.constant 0 : i32
    %c0_i32_0 = arith.constant 0 : i32
    return %arg0, %c0_i32 : i32, i32
  }
  func.func @transform_1(%arg0: i32) -> (i32, i32) {
    %c0_i32 = arith.constant 0 : i32
    %c0_i32_0 = arith.constant 0 : i32
    %c0_i32_1 = arith.constant 0 : i32
    return %c0_i32, %c0_i32_0 : i32, i32
  }
  func.func @transform_2(%arg0: i32) -> (i32, i32) {
    %c0_i32 = arith.constant 0 : i32
    %c0_i32_0 = arith.constant 0 : i32
    %c0_i32_1 = arith.constant 0 : i32
    return %c0_i32, %c0_i32_0 : i32, i32
  }
  func.func @transform_3(%arg0: i32) -> (i32, i32) {
    %c0_i32 = arith.constant 0 : i32
    %c0_i32_0 = arith.constant 0 : i32
    return %arg0, %c0_i32 : i32, i32
  }
}

</mosaic_0001>

<bundles_post_ra>
// kernel: tpu_custom_call.1
= control target key start
LH: loop header
LB: loop body
LE: loop exit
PB: predicated region body
PF: predicated region fallthrough
CT: control target
= control target key end

     0   :  { %8 = vsyncpa [#allocation3], 0  ;;  %s362_s0 = inlined_call_operand.hbm [shape: f32[2,4], index: 0, kind: input, shape index: {}]   ;;  %s363_s1 = inlined_call_operand.vmem [shape: f32[1,128], index: 1, kind: input, shape index: {}]   ;;  %s364_s2 = inlined_call_operand.vmem [shape: f32[1,128], index: 2, kind: input, shape index: {}]   ;;  %s365_s3 = inlined_call_operand.hbm [shape: f32[2,128], index: 3, kind: output, shape index: {}]  }
   0x1   :  { %9 = vsyncpa [#allocation4], 0  ;;  %s279_s12 = smov [#allocation2]   ;;  %s231_s16 = scalar_lea.hbm %s362_s0, 32 }
   0x2   :  { %s16_s13 = sshll.u32 %s279_s12, 4  ;;  %p232_p0 = scmp.ne.s32.totalorder %s362_s0, %s231_s16  ;;  %s17_s13 = int_to_ptr.vmem [resolvable:$true] %s16_s13 }
   0x3   :  { %p235_p1 = scmp.lt.u32.totalorder %s231_s16, %s362_s0 }
   0x5   :  { %p237_p2 = pnand %p235_p1, %p232_p0 }
   0x7   :  { %240 = shalt.err (!%p237_p2)
}
   0x8   :  { %s241_s21 = scalar_lea.vmem %s17_s13, 32  ;;  %p246_p4 = scmp.lt.s32.totalorder %s17_s13, %s17_s13 }
   0x9   :  { %p242_p3 = scmp.ne.s32.totalorder %s17_s13, %s241_s21  ;;  %p247_p5 = scmp.lt.s32.totalorder %s241_s21, %s241_s21 }
   0xb   :  { %p248_p6 = por %p247_p5, %p246_p4 }
   0xd   :  { %p249_p7 = pnand %p248_p6, %p242_p3 }
   0xf   :  { %252 = shalt.err (!%p249_p7)
}
  0x10   :  { %19 = dma.hbm_to_vmem [thread:$0]  %s362_s0, 32, %s17_s13, [#allocation3]  }
  0x11   :  { %275 = dma.done.wait [#allocation3], 32  }
  0x12   :  { %276 = vsyncadd [#allocation3], 4294967264  ;;  %v280_v0 = vmov 0   ;;  %v281_v1 = vmov 2   ;;  %v27_v2 = vld [vmem:[#allocation2] sm:$0x3]  ;;  %v29_v6 = vlaneseq }
  0x13   :  { %222 = vset.pattern.permute.xlu0 %v280_v0  ;;  %224 = vset.pattern.permute.xlu1 %v281_v1  ;;  %v28_v3 = vmul.f32 4.0, %v27_v2  ;;  %v282_v4 = vmov 1   ;;  %v283_v5 = vmov 3   ;;  %v200_v14 = vld [vmem:[%s363_s1] ss:$0 sm:$0xff]  ;;  %s290_s1 = smov [#allocation5]  }
  0x14   :  { %v30_v7 = vand.u32 127, %v29_v6  ;;  %v201_v16 = vld [vmem:[%s364_s2] ss:$0 sm:$0xff]  ;;  %v284_v30 = vmov 683565275   ;;  %s191_s2 = sshll.u32 %s290_s1, 4  ;;  %s192_s2 = int_to_ptr.vmem [resolvable:$true] %s191_s2 }
  0x15   :  { %36 = vperm.xlu0 %222, %v28_v3   ;;  %52 = vperm.xlu1 %224, %v28_v3   ;;  %v285_v32 = vmov 2475754826   ;;  %v286_v35 = vmov 2131351028   ;;  %v287_v38 = vmov 2102212464   ;;  %p258_p9 = scmp.lt.s32.totalorder %s192_s2, %s192_s2 }
  0x16   :  { %vm40_vm0 = vcmp.ge.s32.totalorder %v30_v7, 32  ;;  %vm41_vm1 = vcmp.lt.s32.totalorder %v30_v7, 64  ;;  %vm48_vm2 = vcmp.ge.s32.totalorder %v30_v7, 64  ;;  %vm49_vm3 = vcmp.lt.s32.totalorder %v30_v7, 96  ;;  %s253_s27 = scalar_lea.vmem %s192_s2, 32 }
  0x17   :  { %vm32_vm4 = vcmp.lt.s32.totalorder %v30_v7, 32  ;;  %vm42_vm5 = vmand %vm40_vm0, %vm41_vm1  ;;  %vm56_vm7 = vcmp.ge.s32.totalorder %v30_v7, 96  ;;  %v288_v41 = vmov 920167782   ;;  %v289_v44 = vmov 1326507024   ;;  %p254_p8 = scmp.ne.s32.totalorder %s192_s2, %s253_s27  ;;  %p259_p10 = scmp.lt.s32.totalorder %s253_s27, %s253_s27 }
  0x18   :  { %vm50_vm6 = vmand %vm48_vm2, %vm49_vm3 }
  0x19   :  { %223 = vset.pattern.permute.xlu0 %v282_v4  ;;  %225 = vset.pattern.permute.xlu1 %v283_v5  ;;  %p260_p11 = por %p259_p10, %p258_p9 }
  0x1a   :  { %44 = vperm.xlu0 %223, %v28_v3   ;;  %60 = vperm.xlu1 %225, %v28_v3  }
  0x1b   :  { %p261_p12 = pnand %p260_p11, %p254_p8 }
  0x1e   :  { %226 = vset.pattern.permute.xlu0 %v283_v5 }
  0x94   :  { %v37_v8 = vpop.permute.xlu0 %36  ;;  %v53_v9 = vpop.permute.xlu1 %52 }
  0x95   :  { %v39_v10 = vsel %vm32_vm4, %v37_v8, 0.0 }
  0x99   :  { %v45_v11 = vpop.permute.xlu0 %44  ;;  %v61_v12 = vpop.permute.xlu1 %60 }
  0x9a   :  { %v47_v13 = vsel %vm42_vm5, %v45_v11, %v39_v10 }
  0x9b   :  { %v55_v15 = vsel %vm50_vm6, %v53_v9, %v47_v13 }
  0x9c   :  { %v63_v17 = vsel %vm56_vm7, %v61_v12, %v55_v15 }
  0x9d   :  { %v71_v18 = vmul.f32 %v200_v14, %v63_v17 }
  0x9f   :  { %v329_v19 = vadd.f32 %v201_v16, %v71_v18 }
  0xa1   :  { %v83_v20 = vand.u32 2139095040, %v329_v19  ;;  %v80_v24 = vand.u32 2147483647, %v329_v19  ;;  %vm82_vm15 = vcmp.lt.s32.totalorder %v329_v19, 0  ;;  %vm172_vm4 = vweird.f32 %v329_v19 }
  0xa3   :  { %v84_v21 = vshrl.u32 %v83_v20, 23  ;;  %v87_v28 = vand.u32 8388607, %v80_v24  ;;  %vm81_vm0 = vcmp.le.f32.partialorder %v80_v24, 0.7853982 }
  0xa5   :  { %v202_v22 = vadd.s32 4294967169, %v84_v21  ;;  %v88_v46 = vor.u32 8388608, %v87_v28 }
  0xa7   :  { %v90_v23 = vadd.s32 1, %v202_v22  ;;  %v128_v60 = vshll.u32 %v88_v46, 8 }
  0xa9   :  { %vm91_vm8 = vcmp.gt.s32.totalorder %v90_v23, 0 }
  0xaa   :  { %v92_v25 = vsel %vm91_vm8, %v90_v23, 0 }
  0xab   :  { %v94_v26 = vand.u32 31, %v92_v25  ;;  %v93_v29 = vshrl.u32 %v92_v25, 5 }
  0xad   :  { %v95_v27 = vsub.s32 32, %v94_v26  ;;  %v97_v31 = vshll.u32 %v284_v30, %v94_v26  ;;  %v100_v33 = vshll.u32 %v285_v32, %v94_v26  ;;  %v103_v37 = vshll.u32 %v286_v35, %v94_v26 }
  0xae   :  { %v106_v40 = vshll.u32 %v287_v38, %v94_v26  ;;  %v109_v43 = vshll.u32 %v288_v41, %v94_v26  ;;  %vm112_vm9 = vcmp.lt.s32.totalorder %v93_v29, 1  ;;  %vm115_vm10 = vcmp.lt.s32.totalorder %v93_v29, 4 }
  0xaf   :  { %v98_v34 = vshrl.u32 %v285_v32, %v95_v27  ;;  %v101_v36 = vshrl.u32 %v286_v35, %v95_v27  ;;  %v104_v39 = vshrl.u32 %v287_v38, %v95_v27  ;;  %v107_v42 = vshrl.u32 %v288_v41, %v95_v27 }
  0xb0   :  { %v110_v45 = vshrl.u32 %v289_v44, %v95_v27  ;;  %v96_v55 = vshrl.u32 %v284_v30, %v95_v27  ;;  %vm114_vm11 = vcmp.lt.s32.totalorder %v93_v29, 3  ;;  %vm113_vm12 = vcmp.lt.s32.totalorder %v93_v29, 2 }
  0xb1   :  { %v99_v47 = vor.u32 %v98_v34, %v97_v31  ;;  %v102_v48 = vor.u32 %v101_v36, %v100_v33  ;;  %v105_v49 = vor.u32 %v104_v39, %v103_v37  ;;  %v108_v50 = vor.u32 %v107_v42, %v106_v40 }
  0xb2   :  { %v111_v51 = vor.u32 %v110_v45, %v109_v43 }
  0xb3   :  { %v117_v52 = vsel %vm115_vm10, %v105_v49, 2102212464  ;;  %v120_v53 = vsel %vm112_vm9, %v99_v47, %v102_v48  ;;  %v124_v54 = vsel %vm112_vm9, %v102_v48, %v105_v49  ;;  %v121_v56 = vsel %vm115_vm10, %v108_v50, 920167782 }
  0xb4   :  { %v125_v57 = vsel %vm115_vm10, %v111_v51, 1326507024  ;;  %v122_v58 = vsel %vm114_vm11, %v105_v49, %v121_v56  ;;  %v116_v61 = vsel %vm112_vm9, %v96_v55, %v99_v47  ;;  %v118_v62 = vsel %vm114_vm11, %v102_v48, %v117_v52 }
  0xb5   :  { %v126_v59 = vsel %vm114_vm11, %v108_v50, %v125_v57  ;;  %v123_v63 = vsel %vm113_vm12, %v120_v53, %v122_v58  ;;  %v119_v5 = vsel %vm113_vm12, %v116_v61, %v118_v62 }
  0xb6   :  { %v127_v0 = vsel %vm113_vm12, %v124_v54, %v126_v59  ;;  %v338_v3 = vmul.u32.u64.low %v128_v60, %v123_v63  ;;  %v339_v4 = vmul.u32.u64.high %v128_v60, %v123_v63, %v338_v3  ;;  %v135_v7 = vmul.u32 %v128_v60, %v119_v5 }
  0xb7   :  { %v335_v1 = vmul.u32.u64.low %v128_v60, %v127_v0  ;;  %v336_v2 = vmul.u32.u64.high %v128_v60, %v127_v0, %v335_v1 }
  0xb8   :  { %v138_v6 = vadd.s32 1, %v339_v4 }
  0xb9   :  { %vm137_vm13 = vc.u32 %v336_v2, %v338_v3  ;;  %v136_v20 = vadd.s32 %v338_v3, %v336_v2 }
  0xba   :  { %v139_v8 = vsel %vm137_vm13, %v138_v6, %v339_v4 }
  0xbb   :  { %v140_v9 = vadd.s32 %v139_v8, %v135_v7 }
  0xbd   :  { %v141_v10 = vadd.s32 536870912, %v140_v9 }
  0xbf   :  { %v142_v11 = vshrl.u32 %v141_v10, 30 }
  0xc1   :  { %v143_v12 = vshll.u32 %v142_v11, 30  ;;  %v166_v33 = vsub.s32 4, %v142_v11 }
  0xc3   :  { %v144_v13 = vsub.s32 %v140_v9, %v143_v12  ;;  %v167_v36 = vsel %vm82_vm15, %v166_v33, %v142_v11 }
  0xc4   :  { %v169_v38 = vsel %vm81_vm0, 0, %v167_v36 }
  0xc5   :  { %v146_v14 = vsub.s32 0, %v144_v13  ;;  %v173_v39 = vadd.s32 3, %v169_v38 }
  0xc7   :  { %v203_v15 = vmin.u32 %v146_v14, %v144_v13  ;;  %v174_v40 = vand.u32 3, %v173_v39 }
  0xc9   :  { %v148_v16 = vclz %v203_v15  ;;  %vm179_vm1 = vcmp.eq.s32.totalorder %v174_v40, 2  ;;  %vm176_vm2 = vcmp.eq.s32.totalorder %v174_v40, 0  ;;  %vm175_vm3 = vcmp.lt.s32.totalorder %v174_v40, 2 }
  0xcb   :  { %v204_v17 = vadd.s32 4294967294, %v148_v16 }
  0xcd   :  { %vm205_vm14 = vcmp.lt.s32.totalorder %v204_v17, 0 }
  0xce   :  { %v151_v18 = vsel %vm205_vm14, 0, %v204_v17 }
  0xcf   :  { %v152_v21 = vsub.s32 32, %v151_v18  ;;  %v156_v22 = vsub.s32 4294967266, %v151_v18  ;;  %v153_v23 = vshll.u32 %v144_v13, %v151_v18 }
  0xd1   :  { %v154_v25 = vshrl.u32 %v136_v20, %v152_v21  ;;  %v157_v26 = vadd.s32 127, %v156_v22 }
  0xd3   :  { %v155_v27 = vor.u32 %v154_v25, %v153_v23  ;;  %v158_v28 = vshll.u32 %v157_v26, 23 }
  0xd5   :  { %v159_v29 = vor.u32 4788187, %v158_v28  ;;  %v162_v31 = vcvt.s32.f32 %v155_v27 }
  0xd7   :  { %v160_v30 = vand.u32 2147483647, %v159_v29 }
  0xd9   :  { %v163_v32 = vmul.f32 %v162_v31, %v160_v30 }
  0xdb   :  { %v164_v34 = vxor.u32 2147483648, %v163_v32 }
  0xdd   :  { %v165_v35 = vsel %vm82_vm15, %v164_v34, %v163_v32 }
  0xde   :  { %v168_v37 = vsel %vm81_vm0, %v329_v19, %v165_v35 }
  0xdf   :  { %227 = vcosq.f32 %v168_v37 }
  0xe0   :  { %229 = vsinq.f32 %v168_v37 }
  0xe9   :  { %v228_v41 = vpop.eup %227 }
  0xea   :  { %v230_v42 = vpop.eup %229  ;;  %v180_v43 = vxor.u32 2147483648, %v228_v41 }
  0xeb   :  { %v177_v44 = vxor.u32 2147483648, %v230_v42 }
  0xec   :  { %v181_v45 = vsel %vm179_vm1, %v180_v43, %v230_v42 }
  0xed   :  { %v178_v24 = vsel %vm176_vm2, %v228_v41, %v177_v44 }
  0xee   :  { %v182_v46 = vsel %vm175_vm3, %v178_v24, %v181_v45 }
  0xef   :  { %v183_v47 = vsel %vm172_vm4, nan, %v182_v46 }
  0xf0   :  { %184 = vst [vmem:[#allocation5] sm:$0x3] %v183_v47 }
  0xf1   :  { %264 = shalt.err (!%p261_p12)
}
  0xf2   :  { %s265_s30 = scalar_lea.hbm %s365_s3, 32 }
  0xf3   :  { %p266_p13 = scmp.ne.s32.totalorder %s365_s3, %s265_s30  ;;  %p269_p0 = scmp.lt.u32.totalorder %s265_s30, %s365_s3 }
  0xf5   :  { %p271_p1 = pnand %p269_p0, %p266_p13 }
  0xf7   :  { %274 = shalt.err (!%p271_p1)
}
  0xf8   :  { %194 = dma.vmem_to_hbm [thread:$0]  %s192_s2, 32, %s365_s3, [#allocation4]  }
  0xf9   :  { %277 = dma.done.wait [#allocation4], 32  }
  0xfa   :  { %278 = vsyncadd [#allocation4], 4294967264 }
  0xfb   :  { %198 = vsyncpa [#allocation3], 1 }
  0xfc   :  { %199 = vsyncpa [#allocation4], 1 }

</bundles_post_ra>
